<compile_context>
chip_gen: v7x
topology: tpu7x:2x2x1
jax: 0.10.0
libtpu: 0.0.40
codegen_flags: <defaults>
</compile_context>

<pallas_src>
import jax
import jax.numpy as jnp
from jax.experimental import pallas as pl
from jax.experimental.pallas import tpu as pltpu

EPS = 1e-5


def cond_ln_kernel(x_ref, scale_ref, bias_ref, o_ref):
    # x_ref:     (BB, TC, T)  activation block (reduction axis T is always full)
    # scale_ref: (BB, TC, 1)  precomputed conditioning scale column
    # bias_ref:  (BB, TC, 1)  precomputed conditioning bias column
    x = x_ref[...].astype(jnp.float32)

    mean = jnp.mean(x, axis=-1, keepdims=True)
    xc = x - mean
    var = jnp.mean(xc * xc, axis=-1, keepdims=True)

    # rsqrt on the tiny (BB,TC,1) column (EUP slot), folded with the conditioning scale so
    # the big (BB,TC,T) tensor sees exactly one multiply-add before the store.
    inv = jax.lax.rsqrt(var + EPS)
    s = scale_ref[...].astype(jnp.float32) * inv
    b = bias_ref[...].astype(jnp.float32)

    o_ref[...] = (xc * s + b).astype(o_ref.dtype)


def _largest_divisor_at_most(n, cap):
    cap = max(1, min(n, cap))
    for d in range(cap, 0, -1):
        if n % d == 0:
            return d
    return 1


def _pick_tiles(B, C, T, itemsize, target_bytes=2 << 20):
    """Pick (BB, TC) so an activation block is ~target_bytes while respecting the
    (8,128)/full-dim constraint on the second-to-last block dim (TC % 8 == 0 or TC == C).
    The last block dim is always the full T (required by the reduction; always legal)."""
    per_b = C * T * itemsize
    if per_b <= target_bytes:
        bb = _largest_divisor_at_most(B, target_bytes // per_b)
        tc = C
    else:
        bb = 1
        per_c = T * itemsize
        cap = max(1, target_bytes // per_c)
        tc = C
        for d in range(min(C, cap), 0, -1):
            if C % d == 0 and (d % 8 == 0 or d == C):
                tc = d
                break
    return bb, tc


def conditional_layer_norm(x, speaker_embedding, w_scale, b_scale, w_bias, b_bias):
    """x: [B, C, T]; speaker_embedding: [B, 1, C]; Linear weights [C, C]; biases [C]."""
    B, C, T = x.shape

    # --- Hoisted conditioning (wrapper prologue, one batched matmul each) ---------------
    spk = speaker_embedding[:, 0, :].astype(jnp.float32)                  # [B, C]
    scale = (spk @ w_scale.astype(jnp.float32).T + b_scale)[:, :, None]   # [B, C, 1]
    bias = (spk @ w_bias.astype(jnp.float32).T + b_bias)[:, :, None]      # [B, C, 1]

    itemsize = jnp.dtype(x.dtype).itemsize
    BB, TC = _pick_tiles(B, C, T, itemsize)
    grid = (B // BB, C // TC)

    # TODO(synk): if a real call site has T not a multiple of 128, pad T in the wrapper
    # with in-kernel masking of the padded columns during the mean/var reductions (plain
    # zero-padding would bias the statistics); here T is kept full per block, which is
    # always legal for the BlockSpec regardless of T.
    return pl.pallas_call(
        cond_ln_kernel,
        out_shape=jax.ShapeDtypeStruct((B, C, T), x.dtype),
        grid_spec=pltpu.PrefetchScalarGridSpec(
            num_scalar_prefetch=0,
            grid=grid,
            in_specs=[
                pl.BlockSpec((BB, TC, T), lambda b, c: (b, c, 0)),   # x block
                pl.BlockSpec((BB, TC, 1), lambda b, c: (b, c, 0)),   # scale column
                pl.BlockSpec((BB, TC, 1), lambda b, c: (b, c, 0)),   # bias column
            ],
            out_specs=pl.BlockSpec((BB, TC, T), lambda b, c: (b, c, 0)),
        ),
        compiler_params=pltpu.CompilerParams(
            dimension_semantics=("parallel", "parallel")),
    )(x, scale, bias)


def reference(x, spk, w_scale, b_scale, w_bias, b_bias):
    """Plain-JAX transcription of the PyTorch forward (for verification)."""
    xf = x.astype(jnp.float32)
    mean = jnp.mean(xf, axis=-1, keepdims=True)
    var = jnp.mean((xf - mean) ** 2, axis=-1, keepdims=True)
    y = (xf - mean) / jnp.sqrt(var + EPS)
    scale = jnp.einsum("boc,dc->bod", spk, w_scale) + b_scale[None, None, :]  # [B,1,C]
    bias = jnp.einsum("boc,dc->bod", spk, w_bias) + b_bias[None, None, :]     # [B,1,C]
    scale = jnp.transpose(scale, (0, 2, 1))  # [B, C, 1]
    bias = jnp.transpose(bias, (0, 2, 1))    # [B, C, 1]
    return (y * scale + bias).astype(x.dtype)


if __name__ == "__main__":
    B, C, T = 2, 32, 128  # C == normal_shape == speaker_embedding_dim

    key = jax.random.PRNGKey(0)
    kx, ks, k1, k2, k3, k4 = jax.random.split(key, 6)

    x = jax.random.normal(kx, (B, C, T), dtype=jnp.float32)
    speaker_embedding = jax.random.normal(ks, (B, 1, C), dtype=jnp.float32)

    # The module's reset_parameters uses constants (W=0, scale bias=1, bias bias=0);
    # we use small deterministic random weights so the conditioning path is exercised.
    w_scale = 0.02 * jax.random.normal(k1, (C, C), dtype=jnp.float32)
    b_scale = jnp.ones((C,), dtype=jnp.float32) + 0.01 * jax.random.normal(k2, (C,), jnp.float32)
    w_bias = 0.02 * jax.random.normal(k3, (C, C), dtype=jnp.float32)
    b_bias = 0.01 * jax.random.normal(k4, (C,), dtype=jnp.float32)

    out = conditional_layer_norm(x, speaker_embedding, w_scale, b_scale, w_bias, b_bias)
    out = jax.block_until_ready(out)

    ref = reference(x, speaker_embedding, w_scale, b_scale, w_bias, b_bias)
    assert out.shape == (B, C, T) and out.dtype == jnp.float32
    assert jnp.allclose(out, ref, atol=1e-5, rtol=1e-5), "mismatch vs. reference"

    print("KERNEL_OK")
</pallas_src>

<mosaic_0001>
module attributes {stable_mosaic.version = 11 : i64} {
  func.func @cond_ln_kernel(%arg0: i32, %arg1: i32, %arg2: memref<2x32x128xf32, #tpu.memory_space<vmem>>, %arg3: memref<2x32x1xf32, #tpu.memory_space<vmem>>, %arg4: memref<2x32x1xf32, #tpu.memory_space<vmem>>, %arg5: memref<2x32x128xf32, #tpu.memory_space<vmem>>) attributes {dimension_semantics = [#tpu.dimension_semantics<parallel>, #tpu.dimension_semantics<parallel>], iteration_bounds = array<i64: 1, 1>, scalar_prefetch = 0 : i64, scratch_operands = 0 : i64, tpu.core_type = #tpu.core_type<tc>, window_params = [{transform_indices = @transform_0, window_bounds = array<i64: 2, 32, 128>}, {transform_indices = @transform_1, window_bounds = array<i64: 2, 32, 1>}, {transform_indices = @transform_2, window_bounds = array<i64: 2, 32, 1>}, {transform_indices = @transform_3, window_bounds = array<i64: 2, 32, 128>}]} {
    %c0 = arith.constant 0 : index
    %c0_0 = arith.constant 0 : index
    %c0_1 = arith.constant 0 : index
    %0 = vector.load %arg2[%c0, %c0_0, %c0_1] : memref<2x32x128xf32, #tpu.memory_space<vmem>>, vector<2x32x128xf32>
    %cst = arith.constant dense<0.000000e+00> : vector<2x32xf32>
    %1 = vector.multi_reduction <add>, %0, %cst [2] : vector<2x32x128xf32> to vector<2x32xf32>
    %2 = vector.shape_cast %1 : vector<2x32xf32> to vector<2x32x1xf32>
    %cst_2 = arith.constant 1.280000e+02 : f32
    %3 = vector.broadcast %cst_2 : f32 to vector<2x32x1xf32>
    %4 = arith.divf %2, %3 : vector<2x32x1xf32>
    %5 = vector.broadcast %4 : vector<2x32x1xf32> to vector<2x32x128xf32>
    %6 = arith.subf %0, %5 : vector<2x32x128xf32>
    %7 = arith.mulf %6, %6 : vector<2x32x128xf32>
    %cst_3 = arith.constant dense<0.000000e+00> : vector<2x32xf32>
    %8 = vector.multi_reduction <add>, %7, %cst_3 [2] : vector<2x32x128xf32> to vector<2x32xf32>
    %9 = vector.shape_cast %8 : vector<2x32xf32> to vector<2x32x1xf32>
    %cst_4 = arith.constant 1.280000e+02 : f32
    %10 = vector.broadcast %cst_4 : f32 to vector<2x32x1xf32>
    %11 = arith.divf %9, %10 : vector<2x32x1xf32>
    %cst_5 = arith.constant 9.99999974E-6 : f32
    %12 = vector.broadcast %cst_5 : f32 to vector<2x32x1xf32>
    %13 = arith.addf %11, %12 : vector<2x32x1xf32>
    %14 = math.rsqrt %13 : vector<2x32x1xf32>
    %c0_6 = arith.constant 0 : index
    %c0_7 = arith.constant 0 : index
    %c0_8 = arith.constant 0 : index
    %15 = vector.load %arg3[%c0_6, %c0_7, %c0_8] : memref<2x32x1xf32, #tpu.memory_space<vmem>>, vector<2x32x1xf32>
    %16 = arith.mulf %15, %14 : vector<2x32x1xf32>
    %c0_9 = arith.constant 0 : index
    %c0_10 = arith.constant 0 : index
    %c0_11 = arith.constant 0 : index
    %17 = vector.load %arg4[%c0_9, %c0_10, %c0_11] : memref<2x32x1xf32, #tpu.memory_space<vmem>>, vector<2x32x1xf32>
    %18 = vector.broadcast %16 : vector<2x32x1xf32> to vector<2x32x128xf32>
    %19 = arith.mulf %6, %18 : vector<2x32x128xf32>
    %20 = vector.broadcast %17 : vector<2x32x1xf32> to vector<2x32x128xf32>
    %21 = arith.addf %19, %20 : vector<2x32x128xf32>
    %c0_12 = arith.constant 0 : index
    %c0_13 = arith.constant 0 : index
    %c0_14 = arith.constant 0 : index
    %22 = vector.load %arg5[%c0_12, %c0_13, %c0_14] : memref<2x32x128xf32, #tpu.memory_space<vmem>>, vector<2x32x128xf32>
    tpu.vector_store %arg5[%c0_12, %c0_13, %c0_14], %21 {strides = array<i32>} : memref<2x32x128xf32, #tpu.memory_space<vmem>>, vector<2x32x128xf32>,
    return
  }
  func.func @transform_0(%arg0: i32, %arg1: i32) -> (i32, i32, i32) {
    %c0_i32 = arith.constant 0 : i32
    %c0_i32_0 = arith.constant 0 : i32
    return %arg0, %arg1, %c0_i32 : i32, i32, i32
  }
  func.func @transform_1(%arg0: i32, %arg1: i32) -> (i32, i32, i32) {
    %c0_i32 = arith.constant 0 : i32
    %c0_i32_0 = arith.constant 0 : i32
    return %arg0, %arg1, %c0_i32 : i32, i32, i32
  }
  func.func @transform_2(%arg0: i32, %arg1: i32) -> (i32, i32, i32) {
    %c0_i32 = arith.constant 0 : i32
    %c0_i32_0 = arith.constant 0 : i32
    return %arg0, %arg1, %c0_i32 : i32, i32, i32
  }
  func.func @transform_3(%arg0: i32, %arg1: i32) -> (i32, i32, i32) {
    %c0_i32 = arith.constant 0 : i32
    %c0_i32_0 = arith.constant 0 : i32
    return %arg0, %arg1, %c0_i32 : i32, i32, i32
  }
}

</mosaic_0001>

<bundles_post_ra>
// kernel: tpu_custom_call.1
= control target key start
LH: loop header
LB: loop body
LE: loop exit
PB: predicated region body
PF: predicated region fallthrough
CT: control target
= control target key end

     0   :  { %s442_s0 = inlined_call_operand.vmem [shape: f32[2,32,128], index: 0, kind: input, shape index: {}]   ;;  %s443_s1 = inlined_call_operand.vmem [shape: f32[2,32,1], index: 1, kind: input, shape index: {}]   ;;  %s444_s2 = inlined_call_operand.vmem [shape: f32[2,32,1], index: 2, kind: input, shape index: {}]   ;;  %s445_s3 = inlined_call_operand.hbm [shape: f32[2,32,128], index: 3, kind: output, shape index: {}]  }
   0x1   :  { %v15_v0 = vld [vmem:[%s442_s0] sm:$0xff]  ;;  %v17_v1 = vld [vmem:[%s442_s0 + $0x10] sm:$0xff]  ;;  %v16_v2 = vld [vmem:[%s442_s0 + $0x8] sm:$0xff] }
   0x2   :  { %23 = vadd.xlane.f32.xlu0 %v15_v0  ;;  %27 = vadd.xlane.f32.xlu1 %v17_v1  ;;  %v18_v3 = vld [vmem:[%s442_s0 + $0x18] sm:$0xff] }
   0x3   :  { %8 = vsyncpa [#allocation3], 0  ;;  %v19_v4 = vld [vmem:[%s442_s0 + $0x20] sm:$0xff]  ;;  %v20_v5 = vld [vmem:[%s442_s0 + $0x28] sm:$0xff]  ;;  %v294_v40 = vmov 0  }
   0x4   :  { %v21_v6 = vld [vmem:[%s442_s0 + $0x30] sm:$0xff]  ;;  %v22_v7 = vld [vmem:[%s442_s0 + $0x38] sm:$0xff]  ;;  %252 = vset.pattern.permute.xlu1 %v294_v40  ;;  %253 = vset.pattern.permute.xlu0 %v294_v40  ;;  %v120_v41 = vld [vmem:[%s444_s2] sm:$0xff] }
   0x5   :  { %v121_v42 = vld [vmem:[%s444_s2 + $0x8] sm:$0xff]  ;;  %v122_v43 = vld [vmem:[%s444_s2 + $0x10] sm:$0xff]  ;;  %v123_v44 = vld [vmem:[%s444_s2 + $0x18] sm:$0xff] }
   0x6   :  { %25 = vadd.xlane.f32.xlu0 %v16_v2  ;;  %29 = vadd.xlane.f32.xlu1 %v18_v3  ;;  %v124_v45 = vld [vmem:[%s444_s2 + $0x20] sm:$0xff]  ;;  %v125_v46 = vld [vmem:[%s444_s2 + $0x28] sm:$0xff]  ;;  %v126_v40 = vld [vmem:[%s444_s2 + $0x30] sm:$0xff] }
   0x7   :  { %v104_v63 = vld [vmem:[%s443_s1] sm:$0xff] }
   0xa   :  { %31 = vadd.xlane.f32.xlu0 %v19_v4  ;;  %33 = vadd.xlane.f32.xlu1 %v20_v5 }
   0xe   :  { %35 = vadd.xlane.f32.xlu0 %v21_v6  ;;  %37 = vadd.xlane.f32.xlu1 %v22_v7 }
  0x8f   :  { %v24_v8 = vpop.xlane.xlu0 %23  ;;  %v28_v9 = vpop.xlane.xlu1 %27 }
  0x90   :  { %v40_v10 = vmul.f32 0.0078125, %v24_v8  ;;  %v42_v11 = vmul.f32 0.0078125, %v28_v9  ;;  %v106_v9 = vld [vmem:[%s443_s1 + $0x10] sm:$0xff] }
  0x92   :  { %v342_v12 = vsub.f32 %v15_v0, %v40_v10  ;;  %v344_v13 = vsub.f32 %v17_v1, %v42_v11  ;;  %v127_v10 = vld [vmem:[%s444_s2 + $0x38] sm:$0xff] }
  0x93   :  { %v26_v14 = vpop.xlane.xlu0 %25  ;;  %v30_v15 = vpop.xlane.xlu1 %29 }
  0x94   :  { %v41_v16 = vmul.f32 0.0078125, %v26_v14  ;;  %v56_v17 = vmul.f32 %v342_v12, %v342_v12  ;;  %v43_v18 = vmul.f32 0.0078125, %v30_v15  ;;  %v58_v21 = vmul.f32 %v344_v13, %v344_v13 }
  0x96   :  { %v348_v19 = vsub.f32 %v16_v2, %v41_v16  ;;  %64 = vadd.xlane.f32.xlu0 %v56_v17  ;;  %v350_v20 = vsub.f32 %v18_v3, %v43_v18 }
  0x97   :  { %v32_v22 = vpop.xlane.xlu0 %31  ;;  %v34_v23 = vpop.xlane.xlu1 %33 }
  0x98   :  { %v57_v24 = vmul.f32 %v348_v19, %v348_v19  ;;  %v44_v25 = vmul.f32 0.0078125, %v32_v22  ;;  %v45_v26 = vmul.f32 0.0078125, %v34_v23  ;;  %v59_v28 = vmul.f32 %v350_v20, %v350_v20 }
  0x9a   :  { %66 = vadd.xlane.f32.xlu1 %v57_v24  ;;  %68 = vadd.xlane.f32.xlu0 %v58_v21  ;;  %v356_v27 = vsub.f32 %v19_v4, %v44_v25  ;;  %v360_v29 = vsub.f32 %v20_v5, %v45_v26  ;;  %v105_v5 = vld [vmem:[%s443_s1 + $0x8] sm:$0xff]  ;;  %v107_v21 = vld [vmem:[%s443_s1 + $0x18] sm:$0xff]  ;;  %v108_v25 = vld [vmem:[%s443_s1 + $0x20] sm:$0xff] }
  0x9b   :  { %v36_v30 = vpop.xlane.xlu0 %35  ;;  %v38_v31 = vpop.xlane.xlu1 %37 }
  0x9c   :  { %v60_v32 = vmul.f32 %v356_v27, %v356_v27  ;;  %v46_v33 = vmul.f32 0.0078125, %v36_v30  ;;  %v47_v34 = vmul.f32 0.0078125, %v38_v31  ;;  %v61_v36 = vmul.f32 %v360_v29, %v360_v29  ;;  %v109_v30 = vld [vmem:[%s443_s1 + $0x28] sm:$0xff] }
  0x9e   :  { %70 = vadd.xlane.f32.xlu1 %v59_v28  ;;  %72 = vadd.xlane.f32.xlu0 %v60_v32  ;;  %v364_v35 = vsub.f32 %v21_v6, %v46_v33  ;;  %v368_v37 = vsub.f32 %v22_v7, %v47_v34  ;;  %v110_v33 = vld [vmem:[%s443_s1 + $0x30] sm:$0xff] }
  0xa0   :  { %v62_v38 = vmul.f32 %v364_v35, %v364_v35  ;;  %v63_v39 = vmul.f32 %v368_v37, %v368_v37 }
  0xa2   :  { %74 = vadd.xlane.f32.xlu1 %v61_v36  ;;  %76 = vadd.xlane.f32.xlu0 %v62_v38  ;;  %v111_v38 = vld [vmem:[%s443_s1 + $0x38] sm:$0xff]  ;;  %s295_s1 = smov [#allocation2]  }
  0xa3   :  { %s237_s2 = sshll.u32 %s295_s1, 4  ;;  %s238_s2 = int_to_ptr.vmem [resolvable:$true] %s237_s2 }
  0xa4   :  { %s270_s4 = scalar_lea.vmem %s238_s2, 1024  ;;  %p275_p1 = scmp.lt.s32.totalorder %s238_s2, %s238_s2 }
  0xa5   :  { %p271_p0 = scmp.ne.s32.totalorder %s238_s2, %s270_s4  ;;  %p276_p2 = scmp.lt.s32.totalorder %s270_s4, %s270_s4 }
  0xa6   :  { %78 = vadd.xlane.f32.xlu1 %v63_v39 }
  0xa7   :  { %p277_p3 = por %p276_p2, %p275_p1 }
  0xa9   :  { %p278_p4 = pnand %p277_p3, %p271_p0 }
  0xb7   :  { %178 = vperm.xlu1 %252, %v120_v41  }
  0xb8   :  { %183 = vperm.xlu0 %253, %v121_v42  }
  0xbb   :  { %188 = vperm.xlu1 %252, %v122_v43  }
  0xbc   :  { %193 = vperm.xlu0 %253, %v123_v44  }
  0xbf   :  { %198 = vperm.xlu1 %252, %v124_v45  }
  0xc0   :  { %203 = vperm.xlu0 %253, %v125_v46  }
 0x123   :  { %v65_v47 = vpop.xlane.xlu0 %64 }
 0x124   :  { %v80_v48 = vmul.f32 0.0078125, %v65_v47 }
 0x126   :  { %v88_v49 = vadd.f32 1e-05, %v80_v48 }
 0x127   :  { %v67_v50 = vpop.xlane.xlu1 %66  ;;  %v69_v51 = vpop.xlane.xlu0 %68 }
 0x128   :  { %254 = vrsqrt.f32 %v88_v49  ;;  %v81_v52 = vmul.f32 0.0078125, %v67_v50  ;;  %v82_v53 = vmul.f32 0.0078125, %v69_v51 }
 0x12a   :  { %v89_v54 = vadd.f32 1e-05, %v81_v52  ;;  %v90_v55 = vadd.f32 1e-05, %v82_v53 }
 0x12b   :  { %v71_v56 = vpop.xlane.xlu1 %70  ;;  %v73_v57 = vpop.xlane.xlu0 %72 }
 0x12c   :  { %256 = vrsqrt.f32 %v89_v54  ;;  %v83_v58 = vmul.f32 0.0078125, %v71_v56  ;;  %v84_v59 = vmul.f32 0.0078125, %v73_v57 }
 0x12d   :  { %258 = vrsqrt.f32 %v90_v55 }
 0x12e   :  { %v91_v60 = vadd.f32 1e-05, %v83_v58  ;;  %v92_v62 = vadd.f32 1e-05, %v84_v59 }
 0x12f   :  { %v75_v61 = vpop.xlane.xlu1 %74  ;;  %v77_v1 = vpop.xlane.xlu0 %76 }
 0x130   :  { %260 = vrsqrt.f32 %v91_v60  ;;  %v85_v0 = vmul.f32 0.0078125, %v75_v61  ;;  %v86_v6 = vmul.f32 0.0078125, %v77_v1 }
 0x131   :  { %262 = vrsqrt.f32 %v92_v62 }
 0x132   :  { %v255_v2 = vpop.eup %254  ;;  %v93_v4 = vadd.f32 1e-05, %v85_v0  ;;  %v94_v15 = vadd.f32 1e-05, %v86_v6 }
 0x133   :  { %v112_v3 = vmul.f32 %v255_v2, %v104_v63  ;;  %v79_v7 = vpop.xlane.xlu1 %78 }
 0x134   :  { %264 = vrsqrt.f32 %v93_v4  ;;  %v87_v16 = vmul.f32 0.0078125, %v79_v7 }
 0x135   :  { %130 = vperm.xlu0 %253, %v112_v3   ;;  %266 = vrsqrt.f32 %v94_v15 }
 0x136   :  { %v257_v8 = vpop.eup %256  ;;  %v95_v22 = vadd.f32 1e-05, %v87_v16 }
 0x137   :  { %v259_v11 = vpop.eup %258  ;;  %v113_v14 = vmul.f32 %v257_v8, %v105_v5  ;;  %v184_v41 = vpop.permute.xlu0 %183 }
 0x138   :  { %v114_v17 = vmul.f32 %v259_v11, %v106_v9  ;;  %268 = vrsqrt.f32 %v95_v22  ;;  %v179_v42 = vpop.permute.xlu1 %178 }
 0x139   :  { %135 = vperm.xlu1 %252, %v113_v14   ;;  %213 = vperm.xlu0 %253, %v127_v10  }
 0x13a   :  { %v261_v18 = vpop.eup %260 }
 0x13b   :  { %v115_v23 = vmul.f32 %v261_v18, %v107_v21  ;;  %v263_v24 = vpop.eup %262  ;;  %v194_v43 = vpop.permute.xlu0 %193 }
 0x13c   :  { %v116_v26 = vmul.f32 %v263_v24, %v108_v25  ;;  %v189_v44 = vpop.permute.xlu1 %188 }
 0x13d   :  { %140 = vperm.xlu1 %252, %v114_v17  }
 0x13e   :  { %v265_v28 = vpop.eup %264 }
 0x13f   :  { %v117_v31 = vmul.f32 %v265_v28, %v109_v30  ;;  %v267_v32 = vpop.eup %266  ;;  %v204_v45 = vpop.permute.xlu0 %203 }
 0x140   :  { %v118_v34 = vmul.f32 %v267_v32, %v110_v33  ;;  %v199_v46 = vpop.permute.xlu1 %198 }
 0x141   :  { %145 = vperm.xlu1 %252, %v115_v23  }
 0x142   :  { %v269_v36 = vpop.eup %268 }
 0x143   :  { %v119_v39 = vmul.f32 %v269_v36, %v111_v38 }
 0x145   :  { %150 = vperm.xlu1 %252, %v116_v26  }
 0x149   :  { %155 = vperm.xlu1 %252, %v117_v31  }
 0x14d   :  { %160 = vperm.xlu1 %252, %v118_v34  }
 0x151   :  { %165 = vperm.xlu1 %252, %v119_v39  }
 0x155   :  { %208 = vperm.xlu1 %252, %v126_v40  }
 0x1b4   :  { %v131_v47 = vpop.permute.xlu0 %130 }
 0x1b5   :  { %v168_v48 = vmul.f32 %v131_v47, %v342_v12 }
 0x1b7   :  { %v216_v49 = vadd.f32 %v179_v42, %v168_v48 }
 0x1b8   :  { %v136_v50 = vpop.permute.xlu1 %135  ;;  %v214_v1 = vpop.permute.xlu0 %213 }
 0x1b9   :  { %224 = vst [vmem:[#allocation2] sm:$0xff] %v216_v49  ;;  %v169_v51 = vmul.f32 %v136_v50, %v348_v19 }
 0x1bb   :  { %v217_v52 = vadd.f32 %v184_v41, %v169_v51 }
 0x1bc   :  { %v141_v53 = vpop.permute.xlu1 %140 }
 0x1bd   :  { %225 = vst [vmem:[#allocation2 + $0x8] sm:$0xff] %v217_v52  ;;  %v170_v54 = vmul.f32 %v141_v53, %v344_v13 }
 0x1bf   :  { %v218_v55 = vadd.f32 %v189_v44, %v170_v54 }
 0x1c0   :  { %v146_v56 = vpop.permute.xlu1 %145 }
 0x1c1   :  { %226 = vst [vmem:[#allocation2 + $0x10] sm:$0xff] %v218_v55  ;;  %v171_v57 = vmul.f32 %v146_v56, %v350_v20 }
 0x1c3   :  { %v219_v58 = vadd.f32 %v194_v43, %v171_v57 }
 0x1c4   :  { %v151_v59 = vpop.permute.xlu1 %150 }
 0x1c5   :  { %227 = vst [vmem:[#allocation2 + $0x18] sm:$0xff] %v219_v58  ;;  %v172_v12 = vmul.f32 %v151_v59, %v356_v27 }
 0x1c7   :  { %v220_v60 = vadd.f32 %v199_v46, %v172_v12 }
 0x1c8   :  { %v156_v61 = vpop.permute.xlu1 %155 }
 0x1c9   :  { %228 = vst [vmem:[#allocation2 + $0x20] sm:$0xff] %v220_v60  ;;  %v173_v19 = vmul.f32 %v156_v61, %v360_v29 }
 0x1cb   :  { %v221_v62 = vadd.f32 %v204_v45, %v173_v19 }
 0x1cc   :  { %v161_v63 = vpop.permute.xlu1 %160 }
 0x1cd   :  { %229 = vst [vmem:[#allocation2 + $0x28] sm:$0xff] %v221_v62  ;;  %v174_v20 = vmul.f32 %v161_v63, %v364_v35 }
 0x1d0   :  { %v166_v0 = vpop.permute.xlu1 %165 }
 0x1d1   :  { %v175_v13 = vmul.f32 %v166_v0, %v368_v37 }
 0x1d3   :  { %v223_v2 = vadd.f32 %v214_v1, %v175_v13 }
 0x1d4   :  { %v209_v3 = vpop.permute.xlu1 %208 }
 0x1d5   :  { %231 = vst [vmem:[#allocation2 + $0x38] sm:$0xff] %v223_v2  ;;  %v222_v27 = vadd.f32 %v209_v3, %v174_v20 }
 0x1d7   :  { %230 = vst [vmem:[#allocation2 + $0x30] sm:$0xff] %v222_v27 }
 0x1d8   :  { %281 = shalt.err (!%p278_p4)
}
 0x1d9   :  { %s282_s7 = scalar_lea.hbm %s445_s3, 1024 }
 0x1da   :  { %p283_p5 = scmp.ne.s32.totalorder %s445_s3, %s282_s7  ;;  %p286_p6 = scmp.lt.u32.totalorder %s282_s7, %s445_s3 }
 0x1dc   :  { %p288_p7 = pnand %p286_p6, %p283_p5 }
 0x1de   :  { %291 = shalt.err (!%p288_p7)
}
 0x1df   :  { %s296_s12 = smov 128   ;;  %s297_s13 = smov 8  }
 0x1e0   :  { %243 = dma.vmem_to_hbm [thread:$0]  %s238_s2, 1024, %s445_s3, [#allocation3], %s296_s12, %s296_s12, %s297_s13  }
 0x1e1   :  { %292 = dma.done.wait [#allocation3], 1024  }
 0x1e2   :  { %293 = vsyncadd [#allocation3], 4294966272 }
 0x1e3   :  { %247 = vsyncpa [#allocation3], 1 }

</bundles_post_ra>
